<compile_context>
chip_gen: v6e
topology: v6e:2x2x1
jax: 0.10.0
libtpu: 0.0.40
codegen_flags: <defaults>
</compile_context>

<pallas_src>
import math

import jax
import jax.numpy as jnp
from jax.experimental import pallas as pl
from jax.experimental.pallas import tpu as pltpu

LANE = 128


def _round_up(n, m):
    return ((n + m - 1) // m) * m


def _mlp_kernel(x_ref, w1_ref, w2_ref, w3_ref, b_ref, o_ref):
    f1 = w1_ref.shape[1]
    f2 = w2_ref.shape[1]
    n_actions = w3_ref.shape[1]

    # Bias rows: (3, BW) f32. Sublane selects are free; prefix lane slices only.
    b1 = b_ref[0:1, :f1].astype(jnp.bfloat16)
    b2 = b_ref[1:2, :f2].astype(jnp.bfloat16)
    b3 = b_ref[2:3, :n_actions]                       # f32 for the final add

    # In-kernel cast of the f32 input tile (saves a wrapper-side HBM pass).
    x = x_ref[...].astype(jnp.bfloat16)               # (TM, D)

    # fc1 -> relu : f32 MXU accumulation, bf16 elementwise bias+relu.
    h1 = jnp.dot(x, w1_ref[...], preferred_element_type=jnp.float32)
    h1 = jnp.maximum(h1.astype(jnp.bfloat16) + b1, 0)

    # fc2 -> relu
    h2 = jnp.dot(h1, w2_ref[...], preferred_element_type=jnp.float32)
    h2 = jnp.maximum(h2.astype(jnp.bfloat16) + b2, 0)

    # fc3 : narrow (TM, n_actions) output, f32 accumulation + f32 bias.
    out = jnp.dot(h2, w3_ref[...], preferred_element_type=jnp.float32) + b3
    o_ref[...] = out.astype(o_ref.dtype)


def generic_network_forward(x, params, *, tm=256):
    """3-layer MLP forward with a batch-tiled Pallas kernel.

    x: (batch, input_dim) float32
    params: dict from init_generic_network
    returns: (batch, n_actions) float32
    """
    w1, w2, w3, b_rows = params["w1"], params["w2"], params["w3"], params["b_rows"]
    n_actions = w3.shape[1]
    batch, input_dim = x.shape

    # Batch tile: multiple of 8 sublanes. The grid handles the ragged last
    # block, so no wrapper-side padding/copy of x and no output slice.
    tm_eff = min(tm, _round_up(batch, 8))
    grid = (pl.cdiv(batch, tm_eff),)

    out = pl.pallas_call(
        _mlp_kernel,
        out_shape=jax.ShapeDtypeStruct((batch, n_actions), jnp.float32),
        grid=grid,
        in_specs=[
            pl.BlockSpec((tm_eff, input_dim), lambda i: (i, 0)),  # x tiles (f32)
            pl.BlockSpec(w1.shape, lambda i: (0, 0)),             # resident weights
            pl.BlockSpec(w2.shape, lambda i: (0, 0)),
            pl.BlockSpec(w3.shape, lambda i: (0, 0)),
            pl.BlockSpec(b_rows.shape, lambda i: (0, 0)),         # resident biases
        ],
        out_specs=pl.BlockSpec((tm_eff, n_actions), lambda i: (i, 0)),
        compiler_params=pltpu.CompilerParams(
            dimension_semantics=("parallel",)),
    )(x, w1, w2, w3, b_rows)

    return out


def init_generic_network(key, input_dim, fc1_dims, fc2_dims, n_actions):
    """PyTorch-style U(-1/sqrt(fan_in), 1/sqrt(fan_in)) init.

    Weights stored as (in_features, out_features) (transposed vs nn.Linear),
    cast to bf16 for the MXU. Hidden dims are zero-padded to a multiple of 128
    lanes (exact through ReLU: padded lanes are relu(0+0)=0 and multiply zero
    rows of the next weight). Biases are packed as three f32 rows.
    """
    def linear(key, fan_in, fan_out):
        kw, kb = jax.random.split(key)
        bound = 1.0 / math.sqrt(fan_in)
        w = jax.random.uniform(kw, (fan_in, fan_out), jnp.float32, -bound, bound)
        b = jax.random.uniform(kb, (fan_out,), jnp.float32, -bound, bound)
        return w, b

    k1, k2, k3 = jax.random.split(key, 3)
    w1, b1 = linear(k1, input_dim, fc1_dims)
    w2, b2 = linear(k2, fc1_dims, fc2_dims)
    w3, b3 = linear(k3, fc2_dims, n_actions)

    f1_pad = _round_up(max(fc1_dims, LANE), LANE)
    f2_pad = _round_up(max(fc2_dims, LANE), LANE)

    w1 = jnp.pad(w1, ((0, 0), (0, f1_pad - fc1_dims)))
    b1 = jnp.pad(b1, (0, f1_pad - fc1_dims))
    w2 = jnp.pad(w2, ((0, f1_pad - fc1_dims), (0, f2_pad - fc2_dims)))
    b2 = jnp.pad(b2, (0, f2_pad - fc2_dims))
    w3 = jnp.pad(w3, ((0, f2_pad - fc2_dims), (0, 0)))   # output stays narrow

    bias_width = max(f1_pad, f2_pad, LANE)
    b_rows = jnp.stack([
        jnp.pad(b1, (0, bias_width - f1_pad)),
        jnp.pad(b2, (0, bias_width - f2_pad)),
        jnp.pad(b3, (0, bias_width - n_actions)),
    ])

    return {
        "w1": w1.astype(jnp.bfloat16),
        "w2": w2.astype(jnp.bfloat16),
        "w3": w3.astype(jnp.bfloat16),
        "b_rows": b_rows,
        "fc1_dims": fc1_dims,
        "fc2_dims": fc2_dims,
        "n_actions": n_actions,
    }


def reference_forward(x, params):
    """Pure-JAX f32 reference (same padded params, f32 arithmetic)."""
    w1 = params["w1"].astype(jnp.float32)
    w2 = params["w2"].astype(jnp.float32)
    w3 = params["w3"].astype(jnp.float32)
    b = params["b_rows"]
    na = params["n_actions"]
    h1 = jnp.maximum(x @ w1 + b[0, :w1.shape[1]], 0.0)
    h2 = jnp.maximum(h1 @ w2 + b[1, :w2.shape[1]], 0.0)
    return h2 @ w3 + b[2, :na]


if __name__ == "__main__":
    # Shapes consistent with GenericNetwork(alpha, input_dims=(8,),
    # fc1_dims=32, fc2_dims=32, n_actions=4).
    input_dim, fc1_dims, fc2_dims, n_actions = 8, 32, 32, 4

    key = jax.random.PRNGKey(0)
    k_params, k_small, k_big = jax.random.split(key, 3)
    params = init_generic_network(k_params, input_dim, fc1_dims, fc2_dims, n_actions)

    # Small, module-consistent case: a batch of 2 observations (single tile).
    obs_small = jax.random.normal(k_small, (2, input_dim), jnp.float32)
    out_small = jax.block_until_ready(generic_network_forward(obs_small, params))
    ref_small = reference_forward(obs_small, params)
    assert out_small.shape == (2, n_actions)
    # bf16 matmul operands / bf16 hidden elementwise with f32 accumulation.
    assert jnp.allclose(out_small, ref_small, atol=2e-2, rtol=2e-2)

    # Batched case: multiple grid steps + ragged last block (600 = 2*256 + 88),
    # no wrapper-side padding or slicing.
    obs_big = jax.random.normal(k_big, (600, input_dim), jnp.float32)
    out_big = jax.block_until_ready(generic_network_forward(obs_big, params, tm=256))
    ref_big = reference_forward(obs_big, params)
    assert out_big.shape == (600, n_actions)
    assert jnp.allclose(out_big, ref_big, atol=2e-2, rtol=2e-2)

    print("KERNEL_OK")
</pallas_src>

<mosaic_0001>
module attributes {stable_mosaic.version = 11 : i64} {
  func.func @_mlp_kernel(%arg0: i32, %arg1: memref<8x8xf32, #tpu.memory_space<vmem>>, %arg2: memref<8x128xbf16, #tpu.memory_space<vmem>>, %arg3: memref<128x128xbf16, #tpu.memory_space<vmem>>, %arg4: memref<128x4xbf16, #tpu.memory_space<vmem>>, %arg5: memref<3x128xf32, #tpu.memory_space<vmem>>, %arg6: memref<8x4xf32, #tpu.memory_space<vmem>>) attributes {dimension_semantics = [#tpu.dimension_semantics<parallel>], iteration_bounds = array<i64: 1>, scalar_prefetch = 0 : i64, scratch_operands = 0 : i64, tpu.core_type = #tpu.core_type<tc>, window_params = [{transform_indices = @transform_0, window_bounds = array<i64: 8, 8>}, {pipeline_mode = #tpu.pipeline_mode<synchronous>, transform_indices = @transform_1, window_bounds = array<i64: 8, 128>}, {pipeline_mode = #tpu.pipeline_mode<synchronous>, transform_indices = @transform_2, window_bounds = array<i64: 128, 128>}, {pipeline_mode = #tpu.pipeline_mode<synchronous>, transform_indices = @transform_3, window_bounds = array<i64: 128, 4>}, {pipeline_mode = #tpu.pipeline_mode<synchronous>, transform_indices = @transform_4, window_bounds = array<i64: 3, 128>}, {transform_indices = @transform_5, window_bounds = array<i64: 8, 4>}]} {
    %c0 = arith.constant 0 : index
    %c0_0 = arith.constant 0 : index
    %0 = vector.load %arg5[%c0, %c0_0] : memref<3x128xf32, #tpu.memory_space<vmem>>, vector<1x128xf32>
    %1 = arith.truncf %0 : vector<1x128xf32> to vector<1x128xbf16>
    %c1 = arith.constant 1 : index
    %c0_1 = arith.constant 0 : index
    %2 = vector.load %arg5[%c1, %c0_1] : memref<3x128xf32, #tpu.memory_space<vmem>>, vector<1x128xf32>
    %3 = arith.truncf %2 : vector<1x128xf32> to vector<1x128xbf16>
    %c2 = arith.constant 2 : index
    %c0_2 = arith.constant 0 : index
    %4 = vector.load %arg5[%c2, %c0_2] : memref<3x128xf32, #tpu.memory_space<vmem>>, vector<1x4xf32>
    %c0_3 = arith.constant 0 : index
    %c0_4 = arith.constant 0 : index
    %5 = vector.load %arg1[%c0_3, %c0_4] : memref<8x8xf32, #tpu.memory_space<vmem>>, vector<8x8xf32>
    %6 = arith.truncf %5 : vector<8x8xf32> to vector<8x8xbf16>
    %c0_5 = arith.constant 0 : index
    %c0_6 = arith.constant 0 : index
    %7 = vector.load %arg2[%c0_5, %c0_6] : memref<8x128xbf16, #tpu.memory_space<vmem>>, vector<8x128xbf16>
    %cst = arith.constant dense<0.000000e+00> : vector<8x128xf32>
    %8 = tpu.matmul %6, %7, %cst {dimension_numbers = #tpu.dot_dimension_numbers<[1], [0], [0], [1], [0, 0, 1, 1], [], []>} : vector<8x8xbf16>, vector<8x128xbf16>, vector<8x128xf32> -> vector<8x128xf32>
    %9 = arith.truncf %8 : vector<8x128xf32> to vector<8x128xbf16>
    %10 = vector.broadcast %1 : vector<1x128xbf16> to vector<8x128xbf16>
    %11 = arith.addf %9, %10 : vector<8x128xbf16>
    %cst_7 = arith.constant 0.000000e+00 : bf16
    %12 = vector.broadcast %cst_7 : bf16 to vector<8x128xbf16>
    %13 = arith.maximumf %11, %12 : vector<8x128xbf16>
    %c0_8 = arith.constant 0 : index
    %c0_9 = arith.constant 0 : index
    %14 = vector.load %arg3[%c0_8, %c0_9] : memref<128x128xbf16, #tpu.memory_space<vmem>>, vector<128x128xbf16>
    %cst_10 = arith.constant dense<0.000000e+00> : vector<8x128xf32>
    %15 = tpu.matmul %13, %14, %cst_10 {dimension_numbers = #tpu.dot_dimension_numbers<[1], [0], [0], [1], [0, 0, 1, 1], [], []>} : vector<8x128xbf16>, vector<128x128xbf16>, vector<8x128xf32> -> vector<8x128xf32>
    %16 = arith.truncf %15 : vector<8x128xf32> to vector<8x128xbf16>
    %17 = vector.broadcast %3 : vector<1x128xbf16> to vector<8x128xbf16>
    %18 = arith.addf %16, %17 : vector<8x128xbf16>
    %cst_11 = arith.constant 0.000000e+00 : bf16
    %19 = vector.broadcast %cst_11 : bf16 to vector<8x128xbf16>
    %20 = arith.maximumf %18, %19 : vector<8x128xbf16>
    %c0_12 = arith.constant 0 : index
    %c0_13 = arith.constant 0 : index
    %21 = vector.load %arg4[%c0_12, %c0_13] : memref<128x4xbf16, #tpu.memory_space<vmem>>, vector<128x4xbf16>
    %cst_14 = arith.constant dense<0.000000e+00> : vector<8x4xf32>
    %22 = tpu.matmul %20, %21, %cst_14 {dimension_numbers = #tpu.dot_dimension_numbers<[1], [0], [0], [1], [0, 0, 1, 1], [], []>} : vector<8x128xbf16>, vector<128x4xbf16>, vector<8x4xf32> -> vector<8x4xf32>
    %23 = vector.broadcast %4 : vector<1x4xf32> to vector<8x4xf32>
    %24 = arith.addf %22, %23 : vector<8x4xf32>
    %c0_15 = arith.constant 0 : index
    %c0_16 = arith.constant 0 : index
    %25 = vector.load %arg6[%c0_15, %c0_16] : memref<8x4xf32, #tpu.memory_space<vmem>>, vector<8x4xf32>
    tpu.vector_store %arg6[%c0_15, %c0_16], %24 {strides = array<i32>} : memref<8x4xf32, #tpu.memory_space<vmem>>, vector<8x4xf32>,
    return
  }
  func.func @transform_0(%arg0: i32) -> (i32, i32) {
    %c0_i32 = arith.constant 0 : i32
    %c0_i32_0 = arith.constant 0 : i32
    return %arg0, %c0_i32 : i32, i32
  }
  func.func @transform_1(%arg0: i32) -> (i32, i32) {
    %c0_i32 = arith.constant 0 : i32
    %c0_i32_0 = arith.constant 0 : i32
    %c0_i32_1 = arith.constant 0 : i32
    return %c0_i32, %c0_i32_0 : i32, i32
  }
  func.func @transform_2(%arg0: i32) -> (i32, i32) {
    %c0_i32 = arith.constant 0 : i32
    %c0_i32_0 = arith.constant 0 : i32
    %c0_i32_1 = arith.constant 0 : i32
    return %c0_i32, %c0_i32_0 : i32, i32
  }
  func.func @transform_3(%arg0: i32) -> (i32, i32) {
    %c0_i32 = arith.constant 0 : i32
    %c0_i32_0 = arith.constant 0 : i32
    %c0_i32_1 = arith.constant 0 : i32
    return %c0_i32, %c0_i32_0 : i32, i32
  }
  func.func @transform_4(%arg0: i32) -> (i32, i32) {
    %c0_i32 = arith.constant 0 : i32
    %c0_i32_0 = arith.constant 0 : i32
    %c0_i32_1 = arith.constant 0 : i32
    return %c0_i32, %c0_i32_0 : i32, i32
  }
  func.func @transform_5(%arg0: i32) -> (i32, i32) {
    %c0_i32 = arith.constant 0 : i32
    %c0_i32_0 = arith.constant 0 : i32
    return %arg0, %c0_i32 : i32, i32
  }
}

</mosaic_0001>

<bundles_post_ra>
// kernel: tpu_custom_call.1
= control target key start
LH: loop header
LB: loop body
LE: loop exit
PB: predicated region body
PF: predicated region fallthrough
CT: control target
= control target key end

     0   :  { %10 = vsyncpa [#allocation3], 0  ;;  %s626_s0 = inlined_call_operand.hbm [shape: f32[2,8], index: 0, kind: input, shape index: {}]   ;;  %s627_s1 = inlined_call_operand.vmem [shape: bf16[8,128], index: 1, kind: input, shape index: {}]   ;;  %s628_s2 = inlined_call_operand.vmem [shape: bf16[128,128], index: 2, kind: input, shape index: {}]   ;;  %s629_s3 = inlined_call_operand.vmem [shape: bf16[128,4], index: 3, kind: input, shape index: {}]   ;;  %s630_s4 = inlined_call_operand.vmem [shape: f32[3,128], index: 4, kind: input, shape index: {}]   ;;  %s631_s5 = inlined_call_operand.hbm [shape: f32[2,4], index: 5, kind: output, shape index: {}]  }
   0x1   :  { %11 = vsyncpa [#allocation4], 0 }
   0x2   :  { %16 = vsyncadd [#allocation3], 96  ;;  %s494_s18 = smov [#allocation2]  }
   0x3   :  { %s17_s19 = sshll.u32 %s494_s18, 4  ;;  %s18_s19 = int_to_ptr.vmem [resolvable:$true] %s17_s19 }
   0x4   :  { %s458_s20 = scalar_lea.vmem %s18_s19, 32  ;;  %s462_s21 = scalar_lea.vmem %s18_s19, 128 }
   0x5   :  { %p459_p0 = scmp.ne.s32.totalorder %s18_s19, %s458_s20  ;;  %p463_p1 = scmp.lt.s32.totalorder %s18_s19, %s18_s19 }
   0x6   :  { %p464_p2 = scmp.lt.s32.totalorder %s462_s21, %s458_s20 }
   0x8   :  { %p465_p3 = por %p464_p2, %p463_p1 }
   0xa   :  { %p466_p4 = pnand %p465_p3, %p459_p0 }
   0xc   :  { %469 = shalt.err (!%p466_p4)
}
   0xd   :  { %s495_s22 = smov 32   ;;  %s496_s23 = smov 2  }
   0xe   :  { %23 = dma.hbm_to_vmem [thread:$0]  %s626_s0, 32, %s18_s19, [#allocation3], %s495_s22, %s495_s22, %s496_s23  }
   0xf   :  { %490 = dma.done.wait [#allocation3], 128  }
  0x10   :  { %491 = vsyncadd [#allocation3], 4294967168  ;;  %v497_v0 = vmov 0.0   ;;  %vm498_vm0 = vmmov 0   ;;  %vm48_vm1 = vcmask 1043456   ;;  %v41_v2 = vld [vmem:[#allocation2] sm:$0xff]  ;;  %v96_v19 = vlaneseq }
  0x11   :  { %381 = vmatprep.subr.bf16.mxu0 %v497_v0  ;;  %383 = vmatprep.mubr.msk.bf16.mxu0 %vm498_vm0, %v497_v0  ;;  %v43_v1 = vld [vmem:[%s627_s1] sm:$0xf]  ;;  %v42_v4 = vpack.c.bf16 %v41_v2, %v41_v2  ;;  %v434_v5 = vld [vmem:[%s628_s2 + $0x38] sm:$0xff]   ;;  %vm44_vm2 = vcmask 64512   ;;  %v435_v6 = vld [vmem:[%s628_s2 + $0x30] sm:$0xff]   ;;  %v499_v31 = vmov 0  }
  0x12   :  { %387 = vmatprep.subr.bf16.mxu1 %v497_v0  ;;  %403 = vmatprep.mubr.msk.bf16.mxu1 %vm498_vm0, %v497_v0  ;;  %v50_v3 = vsel %vm48_vm1, %v43_v1, 0  ;;  %v436_v7 = vld [vmem:[%s628_s2 + $0x28] sm:$0xff]   ;;  %v437_v8 = vld [vmem:[%s628_s2 + $0x20] sm:$0xff]   ;;  %v438_v9 = vld [vmem:[%s628_s2 + $0x18] sm:$0xff]   ;;  %v97_v22 = vshrl.u32 %v96_v19, 7  ;;  %vm324_vm3 = vcmask 31744  }
  0x13   :  { %382 = vmatpush3.bf16.msra.mxu0 %v50_v3  ;;  %388 = vmatpush3.bf16.msra.mxu1 %v434_v5  ;;  %v439_v10 = vld [vmem:[%s628_s2 + $0x10] sm:$0xff]   ;;  %v440_v11 = vld [vmem:[%s628_s2 + $0x8] sm:$0xff]   ;;  %v441_v12 = vld [vmem:[%s628_s2] sm:$0xff]  }
  0x14   :  { %407 = vmatprep.subr.bf16.mxu0 %v497_v0  ;;  %389 = vmatprep.subr.bf16.mxu1 %v497_v0  ;;  %v442_v13 = vld [vmem:[%s629_s3 + $0x38] sm:$0xff]   ;;  %v443_v14 = vld [vmem:[%s629_s3 + $0x30] sm:$0xff]   ;;  %v444_v15 = vld [vmem:[%s629_s3 + $0x28] sm:$0xff]   ;;  %v98_v24 = vsub.s32 0, %v97_v22 }
  0x15   :  { %v445_v16 = vld [vmem:[%s629_s3 + $0x20] sm:$0xff]   ;;  %v446_v17 = vld [vmem:[%s629_s3 + $0x18] sm:$0xff]   ;;  %v447_v18 = vld [vmem:[%s629_s3 + $0x10] sm:$0xff]  }
  0x16   :  { %384 = vmatmul.mubr.msk.bf16.vlgmr.msra.gmra.mxu0 %vm44_vm2, %v42_v4  ;;  %v36_v20 = vld [vmem:[%s630_s4] sm:$0x1]  ;;  %v448_v34 = vld [vmem:[%s629_s3 + $0x8] sm:$0xff]   ;;  %v38_v36 = vld [vmem:[%s630_s4 + $0x1] sm:$0x1] }
  0x17   :  { %423 = vmatprep.mubr.msk.bf16.mxu0 %vm498_vm0, %v497_v0  ;;  %390 = vmatpush3.bf16.msra.mxu1 %v435_v6  ;;  %v37_v21 = vpack.c.bf16 %v36_v20, %v36_v20  ;;  %v449_v35 = vld [vmem:[%s629_s3] sm:$0xff]   ;;  %v39_v37 = vpack.c.bf16 %v38_v36, %v38_v36 }
  0x18   :  { %391 = vmatprep.subr.bf16.mxu1 %v497_v0  ;;  %408 = vmatpush3.bf16.msra.mxu0 %v442_v13  ;;  %v352_v47 = vld [vmem:[%s630_s4 + $0x2] ss:$0 sm:$0xff] }
  0x19   :  { %409 = vmatprep.subr.bf16.mxu0 %v497_v0  ;;  %v94_v23 = vpack.i.b16 %v37_v21, %v37_v21  ;;  %v208_v38 = vpack.i.b16 %v39_v37, %v39_v37 }
  0x1b   :  { %392 = vmatpush3.bf16.msra.mxu1 %v436_v7  ;;  %v99_v25 = vrot.slane %v94_v23, %v98_v24  ;;  %v213_v39 = vrot.slane %v208_v38, %v98_v24 }
  0x1c   :  { %393 = vmatprep.subr.bf16.mxu1 %v497_v0  ;;  %410 = vmatpush3.bf16.msra.mxu0 %v443_v14 }
  0x1d   :  { %411 = vmatprep.subr.bf16.mxu0 %v497_v0 }
  0x1f   :  { %394 = vmatpush3.bf16.msra.mxu1 %v437_v8 }
  0x20   :  { %395 = vmatprep.subr.bf16.mxu1 %v497_v0  ;;  %412 = vmatpush3.bf16.msra.mxu0 %v444_v15 }
  0x21   :  { %413 = vmatprep.subr.bf16.mxu0 %v497_v0 }
  0x23   :  { %396 = vmatpush3.bf16.msra.mxu1 %v438_v9 }
  0x24   :  { %397 = vmatprep.subr.bf16.mxu1 %v497_v0  ;;  %414 = vmatpush3.bf16.msra.mxu0 %v445_v16 }
  0x25   :  { %415 = vmatprep.subr.bf16.mxu0 %v497_v0 }
  0x27   :  { %398 = vmatpush3.bf16.msra.mxu1 %v439_v10 }
  0x28   :  { %399 = vmatprep.subr.bf16.mxu1 %v497_v0  ;;  %416 = vmatpush3.bf16.msra.mxu0 %v446_v17 }
  0x29   :  { %417 = vmatprep.subr.bf16.mxu0 %v497_v0 }
  0x2b   :  { %400 = vmatpush3.bf16.msra.mxu1 %v440_v11 }
  0x2c   :  { %401 = vmatprep.subr.bf16.mxu1 %v497_v0  ;;  %418 = vmatpush3.bf16.msra.mxu0 %v447_v18 }
  0x2d   :  { %419 = vmatprep.subr.bf16.mxu0 %v497_v0 }
  0x2f   :  { %402 = vmatpush3.bf16.msra.mxu1 %v441_v12 }
  0x30   :  { %420 = vmatpush3.bf16.msra.mxu0 %v448_v34 }
  0x31   :  { %421 = vmatprep.subr.bf16.mxu0 %v497_v0 }
  0x34   :  { %422 = vmatpush3.bf16.msra.mxu0 %v449_v35 }
  0xd6   :  { %v86_v26 = vpop.f32.mrf.mxu0 }
  0xd7   :  { %v92_v27 = vpack.c.bf16 %v86_v26, %v86_v26 }
  0xd8   :  { %v385_v28 = vpop.f32.mrf.mxu0 }
  0xd9   :  { %v100_v29 = vadd.bf16 %v99_v25, %v92_v27 }
  0xda   :  { %v89_v30 = vpop.f32.mrf.mxu0 }
  0xdb   :  { %v101_v32 = vmax.bf16 %v499_v31, %v100_v29 }
  0xdc   :  { %v386_v33 = vpop.f32.mrf.mxu0 }
  0xdd   :  { %404 = vmatmul.mubr.bf16.vlgmr.msra.gmra.mxu1 %v101_v32 }
 0x19d   :  { %v200_v40 = vpop.f32.mrf.mxu1 }
 0x19e   :  { %v206_v41 = vpack.c.bf16 %v200_v40, %v200_v40 }
 0x19f   :  { %v405_v42 = vpop.f32.mrf.mxu1 }
 0x1a0   :  { %v214_v43 = vadd.bf16 %v213_v39, %v206_v41 }
 0x1a1   :  { %v203_v44 = vpop.f32.mrf.mxu1 }
 0x1a2   :  { %v215_v45 = vmax.bf16 %v499_v31, %v214_v43 }
 0x1a3   :  { %v406_v46 = vpop.f32.mrf.mxu1 }
 0x1a4   :  { %424 = vmatmul.mubr.bf16.vlgmr.msra.gmra.mxu0 %v215_v45 }
 0x264   :  { %v318_v48 = vpop.f32.mrf.mxu0 }
 0x265   :  { %v319_v49 = vadd.f32 %v352_v47, %v318_v48 }
 0x266   :  { %v425_v50 = vpop.f32.mrf.mxu0 }
 0x267   :  { %325 = vst.msk [vmem:[#allocation5] sm:$0xff] %vm324_vm3, %v319_v49 }
 0x268   :  { %v321_v51 = vpop.f32.mrf.mxu0 }
 0x26a   :  { %v426_v52 = vpop.f32.mrf.mxu0 }
 0x26b   :  { %330 = vsyncadd [#allocation4], 96  ;;  %s500_s3 = smov [#allocation5]  }
 0x26c   :  { %s331_s13 = sshll.u32 %s500_s3, 4  ;;  %s332_s13 = int_to_ptr.vmem [resolvable:$true] %s331_s13 }
 0x26d   :  { %s470_s14 = scalar_lea.vmem %s332_s13, 32  ;;  %s474_s15 = scalar_lea.vmem %s332_s13, 128 }
 0x26e   :  { %p471_p5 = scmp.ne.s32.totalorder %s332_s13, %s470_s14  ;;  %p475_p6 = scmp.lt.s32.totalorder %s332_s13, %s332_s13 }
 0x26f   :  { %p476_p7 = scmp.lt.s32.totalorder %s474_s15, %s470_s14 }
 0x271   :  { %p477_p8 = por %p476_p7, %p475_p6 }
 0x273   :  { %p478_p9 = pnand %p477_p8, %p471_p5 }
 0x275   :  { %481 = shalt.err (!%p478_p9)
}
 0x276   :  { %337 = dma.vmem_to_hbm [thread:$0]  %s332_s13, 32, %s631_s5, [#allocation4], %s495_s22, %s495_s22, %s496_s23  }
 0x277   :  { %492 = dma.done.wait [#allocation4], 128  }
 0x278   :  { %493 = vsyncadd [#allocation4], 4294967168 }
 0x279   :  { %341 = vsyncpa [#allocation3], 1 }
 0x27a   :  { %342 = vsyncpa [#allocation4], 1 }

</bundles_post_ra>
